<compile_context>
chip_gen: v5e
topology: v5e:2x2
jax: 0.10.0
libtpu: 0.0.40
codegen_flags: <defaults>
</compile_context>

<pallas_src>
import jax
import jax.numpy as jnp
from jax.experimental import pallas as pl
from jax.experimental.pallas import tpu as pltpu

# mc.text_len in the original module; pick a small, TPU-friendly value.
TEXT_LEN = 32
HIDDEN = 512


def _round_up(x, m):
    return ((x + m - 1) // m) * m


def mlp_relu_kernel(x_ref, w_ref, b_ref, o_ref):
    # x_ref: (TB, K) bf16, w_ref: (K, N) bf16, b_ref: (1, N) f32, o_ref: (TB, N).
    # MXU matmul with f32 accumulation; f32 VPU epilogue; cast at the store.
    y = jnp.dot(x_ref[...], w_ref[...], preferred_element_type=jnp.float32)
    y = y + b_ref[...]                       # broadcast bias over batch rows
    o_ref[...] = jnp.maximum(y, 0.0).astype(o_ref.dtype)


def text_encoder_forward(x, w, b, *, block_b=512, out_dtype=jnp.bfloat16):
    """x: (B, TEXT_LEN), w: (TEXT_LEN, HIDDEN), b: (HIDDEN,) -> (B, HIDDEN)."""
    B, K = x.shape
    K2, N = w.shape
    assert K == K2

    # bf16 inputs (halved HBM traffic, native MXU path); f32 bias for the epilogue.
    x_bf = x.astype(jnp.bfloat16)
    w_bf = w.astype(jnp.bfloat16)
    b2d = b.reshape(1, N).astype(jnp.float32)

    # Batch tile: multiple of 16 rows (bf16 sublane packing), capped at block_b
    # so the double-buffered in/out blocks stay small even on v7x's 64 MiB VMEM.
    tb = min(block_b, _round_up(B, 16))
    b_pad = _round_up(B, tb)
    if b_pad != B:
        x_bf = jnp.pad(x_bf, ((0, b_pad - B), (0, 0)))
    grid = (b_pad // tb,)

    bytes_accessed = (
        b_pad * K * 2          # x (bf16)
        + K * N * 2            # W (bf16, loaded once)
        + N * 4                # bias (f32)
        + b_pad * N * jnp.dtype(out_dtype).itemsize  # output
    )

    out = pl.pallas_call(
        mlp_relu_kernel,
        out_shape=jax.ShapeDtypeStruct((b_pad, N), out_dtype),
        grid=grid,
        in_specs=[
            pl.BlockSpec((tb, K), lambda i: (i, 0)),   # batch tile of x
            pl.BlockSpec((K, N), lambda i: (0, 0)),    # whole W, VMEM-resident
            pl.BlockSpec((1, N), lambda i: (0, 0)),    # whole bias, VMEM-resident
        ],
        out_specs=pl.BlockSpec((tb, N), lambda i: (i, 0)),
        compiler_params=pltpu.CompilerParams(
            dimension_semantics=("parallel",),         # v7x: shard B over 2 TCs
        ),
        cost_estimate=pl.CostEstimate(
            flops=2 * b_pad * K * N,
            bytes_accessed=bytes_accessed,
            transcendentals=0,
        ),
    )(x_bf, w_bf, b2d)

    if b_pad != B:
        out = out[:B]
    return out


if __name__ == "__main__":
    key = jax.random.PRNGKey(0)
    kx, kw, kb = jax.random.split(key, 3)

    B = 8  # small example batch; the wrapper tiles/pads larger batches automatically
    x = jax.random.normal(kx, (B, TEXT_LEN), dtype=jnp.float32)

    # Deterministic parameter init (shapes from nn.Linear(text_len, 512)).
    # PyTorch stores weight as (512, text_len); we keep the transposed layout.
    bound = 1.0 / (TEXT_LEN ** 0.5)
    w = jax.random.uniform(kw, (TEXT_LEN, HIDDEN), jnp.float32, -bound, bound)
    b = jax.random.uniform(kb, (HIDDEN,), jnp.float32, -bound, bound)

    out = text_encoder_forward(x, w, b)
    out = jax.block_until_ready(out)

    # Pure-JAX f32 reference; tolerance loosened for bf16 inputs/outputs.
    ref = jnp.maximum(x @ w + b, 0.0)
    assert out.shape == (B, HIDDEN)
    assert out.dtype == jnp.bfloat16
    assert jnp.allclose(out.astype(jnp.float32), ref, atol=2e-2, rtol=2e-2)

    print("KERNEL_OK")
</pallas_src>

<mosaic_0001>
module attributes {stable_mosaic.version = 11 : i64} {
  func.func @mlp_relu_kernel(%arg0: i32, %arg1: memref<16x32xbf16, #tpu.memory_space<vmem>>, %arg2: memref<32x512xbf16, #tpu.memory_space<vmem>>, %arg3: memref<1x512xf32, #tpu.memory_space<vmem>>, %arg4: memref<16x512xbf16, #tpu.memory_space<vmem>>) attributes {dimension_semantics = [#tpu.dimension_semantics<parallel>], iteration_bounds = array<i64: 1>, scalar_prefetch = 0 : i64, scratch_operands = 0 : i64, tpu.core_type = #tpu.core_type<tc>, window_params = [{transform_indices = @transform_0, window_bounds = array<i64: 16, 32>}, {pipeline_mode = #tpu.pipeline_mode<synchronous>, transform_indices = @transform_1, window_bounds = array<i64: 32, 512>}, {pipeline_mode = #tpu.pipeline_mode<synchronous>, transform_indices = @transform_2, window_bounds = array<i64: 1, 512>}, {transform_indices = @transform_3, window_bounds = array<i64: 16, 512>}]} {
    %c0 = arith.constant 0 : index
    %c0_0 = arith.constant 0 : index
    %0 = vector.load %arg1[%c0, %c0_0] : memref<16x32xbf16, #tpu.memory_space<vmem>>, vector<16x32xbf16>
    %c0_1 = arith.constant 0 : index
    %c0_2 = arith.constant 0 : index
    %1 = vector.load %arg2[%c0_1, %c0_2] : memref<32x512xbf16, #tpu.memory_space<vmem>>, vector<32x512xbf16>
    %cst = arith.constant dense<0.000000e+00> : vector<16x512xf32>
    %2 = tpu.matmul %0, %1, %cst {dimension_numbers = #tpu.dot_dimension_numbers<[1], [0], [0], [1], [0, 0, 1, 1], [], []>} : vector<16x32xbf16>, vector<32x512xbf16>, vector<16x512xf32> -> vector<16x512xf32>
    %c0_3 = arith.constant 0 : index
    %c0_4 = arith.constant 0 : index
    %3 = vector.load %arg3[%c0_3, %c0_4] : memref<1x512xf32, #tpu.memory_space<vmem>>, vector<1x512xf32>
    %4 = vector.broadcast %3 : vector<1x512xf32> to vector<16x512xf32>
    %5 = arith.addf %2, %4 : vector<16x512xf32>
    %cst_5 = arith.constant 0.000000e+00 : f32
    %6 = vector.broadcast %cst_5 : f32 to vector<16x512xf32>
    %7 = arith.maximumf %5, %6 : vector<16x512xf32>
    %8 = arith.truncf %7 : vector<16x512xf32> to vector<16x512xbf16>
    %c0_6 = arith.constant 0 : index
    %c0_7 = arith.constant 0 : index
    %9 = vector.load %arg4[%c0_6, %c0_7] : memref<16x512xbf16, #tpu.memory_space<vmem>>, vector<16x512xbf16>
    tpu.vector_store %arg4[%c0_6, %c0_7], %8 {strides = array<i32>} : memref<16x512xbf16, #tpu.memory_space<vmem>>, vector<16x512xbf16>,
    return
  }
  func.func @transform_0(%arg0: i32) -> (i32, i32) {
    %c0_i32 = arith.constant 0 : i32
    %c0_i32_0 = arith.constant 0 : i32
    return %arg0, %c0_i32 : i32, i32
  }
  func.func @transform_1(%arg0: i32) -> (i32, i32) {
    %c0_i32 = arith.constant 0 : i32
    %c0_i32_0 = arith.constant 0 : i32
    %c0_i32_1 = arith.constant 0 : i32
    return %c0_i32, %c0_i32_0 : i32, i32
  }
  func.func @transform_2(%arg0: i32) -> (i32, i32) {
    %c0_i32 = arith.constant 0 : i32
    %c0_i32_0 = arith.constant 0 : i32
    %c0_i32_1 = arith.constant 0 : i32
    return %c0_i32, %c0_i32_0 : i32, i32
  }
  func.func @transform_3(%arg0: i32) -> (i32, i32) {
    %c0_i32 = arith.constant 0 : i32
    %c0_i32_0 = arith.constant 0 : i32
    return %arg0, %c0_i32 : i32, i32
  }
}

</mosaic_0001>

<bundles_post_ra>
// kernel: tpu_custom_call.1
= control target key start
LH: loop header
LB: loop body
LE: loop exit
PB: predicated region body
PF: predicated region fallthrough
CT: control target
= control target key end

     0   :  { %8 = vsyncpa [#allocation3], 0  ;;  %s427_s0 = inlined_call_operand.hbm [shape: bf16[16,32], index: 0, kind: input, shape index: {}]   ;;  %s428_s1 = inlined_call_operand.hbm [shape: bf16[32,512], index: 1, kind: input, shape index: {}]   ;;  %s429_s2 = inlined_call_operand.hbm [shape: f32[1,512], index: 2, kind: input, shape index: {}]   ;;  %s430_s3 = inlined_call_operand.hbm [shape: bf16[16,512], index: 3, kind: output, shape index: {}]  }
   0x1   :  { %9 = vsyncpa [#allocation6], 0  ;;  %s28_s14 = sshll.u32 %s428_s1, 4  ;;  %s29_s14 = int_to_ptr.hbm [resolvable:$true] %s28_s14 }
   0x2   :  { %10 = vsyncpa [#allocation4], 0  ;;  %s381_s15 = smov [#allocation5]   ;;  %s15_s19 = sshll.u32 %s427_s0, 4  ;;  %s16_s19 = int_to_ptr.hbm [resolvable:$true] %s15_s19 }
   0x3   :  { %s30_s16 = sshll.u32 %s381_s15, 4  ;;  %s382_s20 = smov 256   ;;  %s31_s16 = int_to_ptr.vmem [resolvable:$true] %s30_s16 }
   0x4   :  { %s383_s21 = smov 16   ;;  %s384_s22 = smov [#allocation2]  }
   0x5   :  { %36 = dma.hbm_to_vmem [thread:$0]  %s29_s14, 1024, %s31_s16, [#allocation6], %s382_s20, %s382_s20, %s383_s21  }
   0x6   :  { %s17_s23 = sshll.u32 %s384_s22, 4  ;;  %s385_s1 = smov 64   ;;  %s18_s23 = int_to_ptr.vmem [resolvable:$true] %s17_s23 }
   0x7   :  { %s386_s24 = smov 4   ;;  %s42_s27 = sshll.u32 %s429_s2, 4  ;;  %s43_s27 = int_to_ptr.hbm [resolvable:$true] %s42_s27 }
   0x8   :  { %23 = dma.hbm_to_vmem [thread:$0]  %s16_s19, 128, %s18_s23, [#allocation3], %s385_s1, %s385_s1, %s386_s24  }
   0x9   :  { %s387_s28 = smov [#allocation7]  }
   0xa   :  { %s44_s0 = sshll.u32 %s387_s28, 4  ;;  %s45_s0 = int_to_ptr.vmem [resolvable:$true] %s44_s0 }
   0xb   :  { %47 = dma.hbm_to_vmem [thread:$0]  %s43_s27, 64, %s45_s0, [#allocation6]  }
   0xc   :  { %375 = dma.done.wait [#allocation3], 128  }
   0xd   :  { %376 = vsyncadd [#allocation3], 4294967168 }
   0xe   :  { %377 = dma.done.wait [#allocation6], 1088  }
   0xf   :  { %378 = vsyncadd [#allocation6], 4294966208  ;;  %v244_v0 = vld [vmem:[#allocation5 + $0x20] sm:$0xf]  ;;  %v269_v1 = vld [vmem:[#allocation5 + $0x2c] sm:$0xf0] }
  0x10   :  { %v267_v2 = vld [vmem:[#allocation5 + $0x24] sm:$0xf]  ;;  %v245_v3 = vor.u32 %v269_v1, %v244_v0  ;;  %v246_v4 = vld [vmem:[#allocation5 + $0x30] sm:$0xf0]  ;;  %v252_v5 = vld [vmem:[#allocation5 + $0x28] sm:$0xf] }
  0x11   :  { %v270_v6 = vld [vmem:[#allocation5 + $0x34] sm:$0xf0]  ;;  %v249_v7 = vor.u32 %v267_v2, %v246_v4  ;;  %v268_v9 = vld [vmem:[#allocation5 + $0x2c] sm:$0xf]  ;;  %v254_v10 = vld [vmem:[#allocation5 + $0x38] sm:$0xf0] }
  0x12   :  { %v253_v8 = vor.u32 %v270_v6, %v252_v5  ;;  %v228_v11 = vld [vmem:[#allocation5] sm:$0xf]  ;;  %136 = vmatpush.bf16.msra.mxu0 %v245_v3  ;;  %v257_v12 = vor.u32 %v268_v9, %v254_v10  ;;  %v265_v13 = vld [vmem:[#allocation5 + $0xc] sm:$0xf0]  ;;  %v263_v14 = vld [vmem:[#allocation5 + $0x4] sm:$0xf] }
  0x13   :  { %v230_v15 = vld [vmem:[#allocation5 + $0x10] sm:$0xf0]  ;;  %150 = vmatpush.bf16.msra.mxu1 %v249_v7  ;;  %v229_v16 = vor.u32 %v265_v13, %v228_v11  ;;  %v236_v18 = vld [vmem:[#allocation5 + $0x8] sm:$0xf]  ;;  %v266_v19 = vld [vmem:[#allocation5 + $0x14] sm:$0xf0] }
  0x14   :  { %164 = vmatpush.bf16.msra.mxu2 %v253_v8  ;;  %v233_v17 = vor.u32 %v263_v14, %v230_v15  ;;  %v264_v20 = vld [vmem:[#allocation5 + $0xc] sm:$0xf]  ;;  %178 = vmatpush.bf16.msra.mxu3 %v257_v12  ;;  %v237_v21 = vor.u32 %v266_v19, %v236_v18  ;;  %v238_v22 = vld [vmem:[#allocation5 + $0x18] sm:$0xf0]  ;;  %vm126_vm0 = vcmask 261120   ;;  %s388_s2 = smov [#allocation8]  }
  0x15   :  { %v241_v23 = vor.u32 %v264_v20, %v238_v22  ;;  %v262_v24 = vld [vmem:[#allocation2] sm:$0xff]  ;;  %v71_v25 = vld [vmem:[#allocation7] sm:$0xf]  ;;  %s206_s29 = sshll.u32 %s388_s2, 4  ;;  %s208_s5 = sshll.u32 %s430_s3, 4  ;;  %s207_s29 = int_to_ptr.vmem [resolvable:$true] %s206_s29  ;;  %s209_s5 = int_to_ptr.hbm [resolvable:$true] %s208_s5 }
  0x16   :  { %137 = vmatpush.bf16.msra.mxu0 %v229_v16  ;;  %v73_v26 = vperm.slane %v71_v25, 0  ;;  %v74_v27 = vperm.slane %v71_v25, 1  ;;  %v75_v34 = vperm.slane %v71_v25, 2  ;;  %v76_v35 = vperm.slane %v71_v25, 3 }
  0x17   :  { %151 = vmatpush.bf16.msra.mxu1 %v233_v17 }
  0x18   :  { %165 = vmatpush.bf16.msra.mxu2 %v237_v21  ;;  %179 = vmatpush.bf16.msra.mxu3 %v241_v23 }
  0x19   :  { %258 = vmatmul.msk.bf16.vlgmr.msra.gmra.mxu0 %vm126_vm0, %v262_v24 }
  0x1a   :  { %259 = vmatmul.msk.bf16.vlgmr.msra.gmra.mxu1 %vm126_vm0, %v262_v24 }
  0x1b   :  { %260 = vmatmul.msk.bf16.vlgmr.msra.gmra.mxu2 %vm126_vm0, %v262_v24  ;;  %261 = vmatmul.msk.bf16.vlgmr.msra.gmra.mxu3 %vm126_vm0, %v262_v24 }
  0x96   :  { %v139_v28 = vpop.f32.mrf.mxu0 }
  0x97   :  { %v140_v29 = vadd.f32 %v139_v28, %v73_v26  ;;  %v153_v30 = vpop.f32.mrf.mxu1 }
  0x98   :  { %v154_v31 = vadd.f32 %v153_v30, %v74_v27 }
  0x99   :  { %v186_v32 = vmax.f32 %v140_v29, 0.0 }
  0x9a   :  { %v187_v33 = vmax.f32 %v154_v31, 0.0 }
  0x9c   :  { %v194_v36 = vpack.c.bf16 %v187_v33, %v186_v32 }
  0x9e   :  { %v167_v37 = vpop.f32.mrf.mxu2  ;;  %198 = vst [vmem:[#allocation8] sm:$0xff] %v194_v36  ;;  %v181_v39 = vpop.f32.mrf.mxu3 }
  0x9f   :  { %v168_v38 = vadd.f32 %v167_v37, %v75_v34  ;;  %v141_v40 = vpop.f32.mrf.mxu0  ;;  %v182_v41 = vadd.f32 %v181_v39, %v76_v35  ;;  %v155_v43 = vpop.f32.mrf.mxu1 }
  0xa0   :  { %v142_v42 = vadd.f32 %v141_v40, %v73_v26  ;;  %v156_v45 = vadd.f32 %v155_v43, %v74_v27 }
  0xa1   :  { %v188_v44 = vmax.f32 %v168_v38, 0.0  ;;  %v189_v46 = vmax.f32 %v182_v41, 0.0 }
  0xa2   :  { %v190_v47 = vmax.f32 %v142_v42, 0.0  ;;  %v191_v48 = vmax.f32 %v156_v45, 0.0 }
  0xa3   :  { %v195_v49 = vpack.c.bf16 %v189_v46, %v188_v44 }
  0xa4   :  { %v196_v50 = vpack.c.bf16 %v191_v48, %v190_v47 }
  0xa5   :  { %199 = vst [vmem:[#allocation8 + $0x8] sm:$0xff] %v195_v49 }
  0xa6   :  { %v169_v51 = vpop.f32.mrf.mxu2  ;;  %200 = vst [vmem:[#allocation8 + $0x10] sm:$0xff] %v196_v50  ;;  %v183_v53 = vpop.f32.mrf.mxu3 }
  0xa7   :  { %v170_v52 = vadd.f32 %v169_v51, %v75_v34  ;;  %v184_v54 = vadd.f32 %v183_v53, %v76_v35 }
  0xa9   :  { %v192_v55 = vmax.f32 %v170_v52, 0.0  ;;  %v193_v56 = vmax.f32 %v184_v54, 0.0 }
  0xab   :  { %v197_v57 = vpack.c.bf16 %v193_v56, %v192_v55 }
  0xad   :  { %201 = vst [vmem:[#allocation8 + $0x18] sm:$0xff] %v197_v57 }
  0xae   :  { %214 = dma.vmem_to_hbm [thread:$0]  %s207_s29, 512, %s209_s5, [#allocation4], %s382_s20, %s382_s20, %s383_s21  }
  0xaf   :  { %379 = dma.done.wait [#allocation4], 512  }
  0xb0   :  { %380 = vsyncadd [#allocation4], 4294966784 }
  0xb1   :  { %219 = vsyncpa [#allocation3], 1 }
  0xb2   :  { %220 = vsyncpa [#allocation6], 1 }
  0xb3   :  { %221 = vsyncpa [#allocation4], 1 }

</bundles_post_ra>
